<compile_context>
chip_gen: v5e
topology: v5e:2x2
jax: 0.10.0
libtpu: 0.0.40
codegen_flags: <defaults>
</compile_context>

<pallas_src>
import jax
import jax.numpy as jnp
from jax.experimental import pallas as pl
from jax.experimental.pallas import tpu as pltpu


def _round_up(n, m):
    return ((n + m - 1) // m) * m


def _num_tensorcores():
    """Best-effort TensorCore count of the local chip (grid split factor).

    v5e / v6e have 1 TC per chip (and per JAX device); v7x has 2 TCs that a
    single pallas_call can use via dimension_semantics=("parallel",); v4/v5p
    megacore likewise exposes 2 cores behind one device.  Defaults to 1 on any
    uncertainty, which is always correct (just single-step).
    """
    try:
        dev = jax.devices()[0]
        n = getattr(dev, "num_cores", None)
        if isinstance(n, int) and n > 0:
            return n
        kind = str(getattr(dev, "device_kind", "")).lower()
        if any(tag in kind for tag in ("7", "v4", "v5p")):
            return 2
    except Exception:
        pass
    return 1


def make_layernorm_kernel(H, eps):
    """Kernel over one (RB, HP) row-block; columns >= H are zero padding."""

    def kernel(x_ref, a_ref, b_ref, o_ref):
        x = x_ref[...]                                           # (RB, HP) f32
        # Padded lanes of x are exactly zero (wrapper guarantees it), so the
        # plain lane-sum is already the masked sum; divide by the REAL H.
        mean = jnp.sum(x, axis=-1, keepdims=True) * (1.0 / H)
        # Zero the padded lanes of d before the d*d reduction: at padded lanes
        # x - mean == -mean, which would otherwise corrupt the variance.
        lane = jax.lax.broadcasted_iota(jnp.int32, x.shape, 1)
        d = jnp.where(lane < H, x - mean, 0.0)
        var = jnp.sum(d * d, axis=-1, keepdims=True) * (1.0 / (H - 1))  # unbiased
        inv = pl.reciprocal(jnp.sqrt(var) + eps, approx=True)           # EUP slot
        o_ref[...] = (a_ref[...] * (d * inv) + b_ref[...]).astype(o_ref.dtype)

    return kernel


def layer_norm_forward(x, a_2, b_2, eps=1e-6):
    """x: (..., H) float32; a_2, b_2: (H,).  Matches the PyTorch LayerNorm spec."""
    orig_shape = x.shape
    H = int(orig_shape[-1])
    N = 1
    for s in orig_shape[:-1]:
        N *= int(s)

    # Lane-dense feature dim (unmasked stores, full vreg occupancy).
    HP = _round_up(max(H, 128), 128)

    # Chip-aware grid: 1 step on single-TC chips, num_TCs parallel steps otherwise.
    steps = max(1, min(_num_tensorcores(), max(1, N // 8)))
    NP = _round_up(N, 8 * steps)            # keep the sublane dim a multiple of 8
    RB = NP // steps                        # rows per grid step

    # Zero-pad rows and columns in the wrapper (free relative to the kernel).
    x2 = jnp.zeros((NP, HP), jnp.float32).at[:N, :H].set(
        x.reshape(N, H).astype(jnp.float32))
    a2 = jnp.zeros((1, HP), jnp.float32).at[0, :H].set(
        a_2.reshape(H).astype(jnp.float32))
    b2 = jnp.zeros((1, HP), jnp.float32).at[0, :H].set(
        b_2.reshape(H).astype(jnp.float32))

    # Right-sized VMEM: double-buffered x/out blocks + params + a few MiB headroom.
    block_bytes = 2 * (2 * RB * HP * 4) + 2 * (2 * HP * 4)
    vmem_limit = int(min(block_bytes + 4 * 1024 * 1024, 64 * 1024 * 1024))

    cost = pl.CostEstimate(
        flops=8 * N * H,                    # sub, mul, two reductions, affine
        transcendentals=2 * N,              # sqrt + reciprocal per row
        bytes_accessed=int(2 * NP * HP * 4 + 2 * HP * 4))

    out = pl.pallas_call(
        make_layernorm_kernel(H, eps),
        out_shape=jax.ShapeDtypeStruct((NP, HP), jnp.float32),
        grid=(steps,),
        in_specs=[
            pl.BlockSpec((RB, HP), lambda i: (i, 0)),   # x row-block
            pl.BlockSpec((1, HP), lambda i: (0, 0)),    # a_2 (grid-invariant)
            pl.BlockSpec((1, HP), lambda i: (0, 0)),    # b_2 (grid-invariant)
        ],
        out_specs=pl.BlockSpec((RB, HP), lambda i: (i, 0)),
        compiler_params=pltpu.CompilerParams(
            dimension_semantics=("parallel",),
            vmem_limit_bytes=vmem_limit),
        cost_estimate=cost,
    )(x2, a2, b2)

    return out[:N, :H].reshape(orig_shape)


def layer_norm_reference(x, a_2, b_2, eps=1e-6):
    """Pure-JAX reference with the spec's exact semantics (unbiased std, eps on std)."""
    H = x.shape[-1]
    mean = x.mean(-1, keepdims=True)
    d = x - mean
    std = jnp.sqrt(jnp.sum(d * d, axis=-1, keepdims=True) / (H - 1))
    return a_2 * d / (std + eps) + b_2


if __name__ == "__main__":
    # Shapes as used in graph_network.py: (batch graphs, nodes, hidden) = (16, 8, 32).
    B, K, H = 16, 8, 32

    key = jax.random.PRNGKey(0)
    kx, ka, kb = jax.random.split(key, 3)

    x = jax.random.normal(kx, (B, K, H), jnp.float32)
    # Module init is ones/zeros; use non-trivial deterministic values so the
    # affine (a_2, b_2) path is actually exercised by the check.
    a_2 = 1.0 + 0.1 * jax.random.normal(ka, (H,), jnp.float32)
    b_2 = 0.1 * jax.random.normal(kb, (H,), jnp.float32)

    out = jax.block_until_ready(layer_norm_forward(x, a_2, b_2))
    ref = layer_norm_reference(x, a_2, b_2)

    assert out.shape == (B, K, H)
    max_diff = float(jnp.max(jnp.abs(out - ref)))
    assert jnp.allclose(out, ref, atol=5e-3, rtol=5e-3), (
        "mismatch vs reference, max |diff| = %g" % max_diff)

    print("KERNEL_OK")
</pallas_src>

<mosaic_0001>
module attributes {stable_mosaic.version = 11 : i64} {
  func.func @kernel(%arg0: i32, %arg1: memref<128x128xf32, #tpu.memory_space<vmem>>, %arg2: memref<1x128xf32, #tpu.memory_space<vmem>>, %arg3: memref<1x128xf32, #tpu.memory_space<vmem>>, %arg4: memref<128x128xf32, #tpu.memory_space<vmem>>) attributes {dimension_semantics = [#tpu.dimension_semantics<parallel>], iteration_bounds = array<i64: 1>, scalar_prefetch = 0 : i64, scratch_operands = 0 : i64, tpu.core_type = #tpu.core_type<tc>, window_params = [{transform_indices = @transform_0, window_bounds = array<i64: 128, 128>}, {pipeline_mode = #tpu.pipeline_mode<synchronous>, transform_indices = @transform_1, window_bounds = array<i64: 1, 128>}, {pipeline_mode = #tpu.pipeline_mode<synchronous>, transform_indices = @transform_2, window_bounds = array<i64: 1, 128>}, {transform_indices = @transform_3, window_bounds = array<i64: 128, 128>}]} {
    %c0 = arith.constant 0 : index
    %c0_0 = arith.constant 0 : index
    %0 = vector.load %arg1[%c0, %c0_0] : memref<128x128xf32, #tpu.memory_space<vmem>>, vector<128x128xf32>
    %cst = arith.constant dense<0.000000e+00> : vector<128xf32>
    %1 = vector.multi_reduction <add>, %0, %cst [1] : vector<128x128xf32> to vector<128xf32>
    %2 = vector.shape_cast %1 : vector<128xf32> to vector<128x1xf32>
    %cst_1 = arith.constant 3.125000e-02 : f32
    %3 = vector.broadcast %cst_1 : f32 to vector<128x1xf32>
    %4 = arith.mulf %2, %3 : vector<128x1xf32>
    %5 = tpu.iota {dimensions = array<i32: 1>} : vector<128x128xi32>
    %c32_i32 = arith.constant 32 : i32
    %6 = vector.broadcast %c32_i32 : i32 to vector<128x128xi32>
    %7 = arith.cmpi slt, %5, %6 : vector<128x128xi32>
    %8 = vector.broadcast %4 : vector<128x1xf32> to vector<128x128xf32>
    %9 = arith.subf %0, %8 : vector<128x128xf32>
    %cst_2 = arith.constant 0.000000e+00 : f32
    %10 = vector.broadcast %cst_2 : f32 to vector<128x128xf32>
    %11 = arith.select %7, %9, %10 : vector<128x128xi1>, vector<128x128xf32>
    %12 = arith.mulf %11, %11 : vector<128x128xf32>
    %cst_3 = arith.constant dense<0.000000e+00> : vector<128xf32>
    %13 = vector.multi_reduction <add>, %12, %cst_3 [1] : vector<128x128xf32> to vector<128xf32>
    %14 = vector.shape_cast %13 : vector<128xf32> to vector<128x1xf32>
    %cst_4 = arith.constant 0.0322580636 : f32
    %15 = vector.broadcast %cst_4 : f32 to vector<128x1xf32>
    %16 = arith.mulf %14, %15 : vector<128x1xf32>
    %17 = math.sqrt %16 : vector<128x1xf32>
    %cst_5 = arith.constant 9.99999997E-7 : f32
    %18 = vector.broadcast %cst_5 : f32 to vector<128x1xf32>
    %19 = arith.addf %17, %18 : vector<128x1xf32>
    %20 = tpu.reciprocal %19 {approx = true} : vector<128x1xf32> -> vector<128x1xf32>
    %c0_6 = arith.constant 0 : index
    %c0_7 = arith.constant 0 : index
    %21 = vector.load %arg2[%c0_6, %c0_7] : memref<1x128xf32, #tpu.memory_space<vmem>>, vector<1x128xf32>
    %22 = vector.broadcast %20 : vector<128x1xf32> to vector<128x128xf32>
    %23 = arith.mulf %11, %22 : vector<128x128xf32>
    %24 = vector.broadcast %21 : vector<1x128xf32> to vector<128x128xf32>
    %25 = arith.mulf %24, %23 : vector<128x128xf32>
    %c0_8 = arith.constant 0 : index
    %c0_9 = arith.constant 0 : index
    %26 = vector.load %arg3[%c0_8, %c0_9] : memref<1x128xf32, #tpu.memory_space<vmem>>, vector<1x128xf32>
    %27 = vector.broadcast %26 : vector<1x128xf32> to vector<128x128xf32>
    %28 = arith.addf %25, %27 : vector<128x128xf32>
    %c0_10 = arith.constant 0 : index
    %c0_11 = arith.constant 0 : index
    %29 = vector.load %arg4[%c0_10, %c0_11] : memref<128x128xf32, #tpu.memory_space<vmem>>, vector<128x128xf32>
    tpu.vector_store %arg4[%c0_10, %c0_11], %28 {strides = array<i32>} : memref<128x128xf32, #tpu.memory_space<vmem>>, vector<128x128xf32>,
    return
  }
  func.func @transform_0(%arg0: i32) -> (i32, i32) {
    %c0_i32 = arith.constant 0 : i32
    %c0_i32_0 = arith.constant 0 : i32
    return %arg0, %c0_i32 : i32, i32
  }
  func.func @transform_1(%arg0: i32) -> (i32, i32) {
    %c0_i32 = arith.constant 0 : i32
    %c0_i32_0 = arith.constant 0 : i32
    %c0_i32_1 = arith.constant 0 : i32
    return %c0_i32, %c0_i32_0 : i32, i32
  }
  func.func @transform_2(%arg0: i32) -> (i32, i32) {
    %c0_i32 = arith.constant 0 : i32
    %c0_i32_0 = arith.constant 0 : i32
    %c0_i32_1 = arith.constant 0 : i32
    return %c0_i32, %c0_i32_0 : i32, i32
  }
  func.func @transform_3(%arg0: i32) -> (i32, i32) {
    %c0_i32 = arith.constant 0 : i32
    %c0_i32_0 = arith.constant 0 : i32
    return %arg0, %c0_i32 : i32, i32
  }
}

</mosaic_0001>

<bundles_post_ra>
// kernel: tpu_custom_call.1
= control target key start
LH: loop header
LB: loop body
LE: loop exit
PB: predicated region body
PF: predicated region fallthrough
CT: control target
= control target key end

     0   :  { %8 = vsyncpa [#allocation3], 0  ;;  %s1087_s0 = inlined_call_operand.hbm [shape: f32[128,128], index: 0, kind: input, shape index: {}]   ;;  %s1088_s1 = inlined_call_operand.hbm [shape: f32[1,128], index: 1, kind: input, shape index: {}]   ;;  %s1089_s2 = inlined_call_operand.vmem [shape: f32[1,128], index: 2, kind: input, shape index: {}]   ;;  %s1090_s3 = inlined_call_operand.hbm [shape: f32[128,128], index: 3, kind: output, shape index: {}]  }
   0x1   :  { %9 = vsyncpa [#allocation6], 0 }
   0x2   :  { %10 = vsyncpa [#allocation4], 0  ;;  %s15_s14 = sshll.u32 %s1087_s0, 4  ;;  %s673_s15 = smov [#allocation2]   ;;  %s16_s14 = int_to_ptr.hbm [resolvable:$true] %s15_s14 }
   0x3   :  { %s17_s16 = sshll.u32 %s673_s15, 4  ;;  %s29_s19 = sshll.u32 %s1088_s1, 4  ;;  %s18_s16 = int_to_ptr.vmem [resolvable:$true] %s17_s16  ;;  %s30_s19 = int_to_ptr.hbm [resolvable:$true] %s29_s19 }
   0x4   :  { %s674_s20 = smov 128   ;;  %s675_s21 = smov 8  }
   0x5   :  { %23 = dma.hbm_to_vmem [thread:$0]  %s16_s14, 2048, %s18_s16, [#allocation3], %s674_s20, %s674_s20, %s675_s21  }
   0x6   :  { %s676_s22 = smov [#allocation5]  }
   0x7   :  { %s31_s23 = sshll.u32 %s676_s22, 4  ;;  %s32_s23 = int_to_ptr.vmem [resolvable:$true] %s31_s23 }
   0x8   :  { %34 = dma.hbm_to_vmem [thread:$0]  %s30_s19, 16, %s32_s23, [#allocation6]  }
   0x9   :  { %667 = dma.done.wait [#allocation3], 2048  }
   0xa   :  { %668 = vsyncadd [#allocation3], 4294965248 }
   0xb   :  { %669 = dma.done.wait [#allocation6], 16  }
   0xc   :  { %670 = vsyncadd [#allocation6], 4294967280  ;;  %v707_v0 = vld [vmem:[#allocation2 + $0x20] sm:$0xff]  ;;  %v47_v1 = vld [vmem:[#allocation2 + $0x10] sm:$0xff]  ;;  %v109_v16 = vlaneseq  ;;  %s510_s27 = sshll.u32 %s1090_s3, 4  ;;  %s511_s27 = int_to_ptr.hbm [resolvable:$true] %s510_s27 }
   0xd   :  { %v45_v2 = vld [vmem:[#allocation2] sm:$0xff]  ;;  %69 = vadd.xlane.f32.xlu2 %v707_v0  ;;  %65 = vadd.xlane.f32.xlu1 %v47_v1  ;;  %v50_v3 = vld [vmem:[#allocation2 + $0x28] sm:$0xff]  ;;  %v48_v4 = vld [vmem:[#allocation2 + $0x18] sm:$0xff] }
   0xe   :  { %61 = vadd.xlane.f32.xlu0 %v45_v2  ;;  %v46_v5 = vld [vmem:[#allocation2 + $0x8] sm:$0xff]  ;;  %v710_v6 = vld [vmem:[#allocation2 + $0x40] sm:$0xff]  ;;  %v712_v7 = vld [vmem:[#allocation2 + $0x38] sm:$0xff]  ;;  %v740_v17 = vand.u32 127, %v109_v16 }
   0xf   :  { %v714_v8 = vld [vmem:[#allocation2 + $0x30] sm:$0xff]  ;;  %v719_v9 = vld [vmem:[#allocation2 + $0x58] sm:$0xff]  ;;  %v723_v11 = vld [vmem:[#allocation2 + $0x48] sm:$0xff] }
  0x10   :  { %v721_v10 = vld [vmem:[#allocation2 + $0x50] sm:$0xff]  ;;  %v730_v13 = vld [vmem:[#allocation2 + $0x68] sm:$0xff]  ;;  %v732_v14 = vld [vmem:[#allocation2 + $0x60] sm:$0xff]  ;;  %vm111_vm0 = vcmp.lt.s32.totalorder %v740_v17, 32 }
  0x11   :  { %v728_v12 = vld [vmem:[#allocation2 + $0x70] sm:$0xff]  ;;  %v737_v15 = vld [vmem:[#allocation2 + $0x78] sm:$0xff] }
  0x15   :  { %71 = vadd.xlane.f32.xlu2 %v50_v3  ;;  %67 = vadd.xlane.f32.xlu1 %v48_v4 }
  0x16   :  { %63 = vadd.xlane.f32.xlu0 %v46_v5 }
  0x1d   :  { %77 = vadd.xlane.f32.xlu2 %v710_v6  ;;  %75 = vadd.xlane.f32.xlu1 %v712_v7 }
  0x1e   :  { %73 = vadd.xlane.f32.xlu0 %v714_v8 }
  0x25   :  { %83 = vadd.xlane.f32.xlu2 %v719_v9  ;;  %81 = vadd.xlane.f32.xlu1 %v721_v10 }
  0x26   :  { %79 = vadd.xlane.f32.xlu0 %v723_v11 }
  0x2d   :  { %89 = vadd.xlane.f32.xlu2 %v728_v12  ;;  %87 = vadd.xlane.f32.xlu1 %v730_v13 }
  0x2e   :  { %85 = vadd.xlane.f32.xlu0 %v732_v14 }
  0x36   :  { %91 = vadd.xlane.f32.xlu0 %v737_v15 }
  0x80   :  { %v70_v18 = vpop.xlane.xlu2 %69  ;;  %v66_v19 = vpop.xlane.xlu1 %65 }
  0x81   :  { %v95_v20 = vmul.f32 0.03125, %v66_v19  ;;  %v62_v21 = vpop.xlane.xlu0 %61  ;;  %v97_v37 = vmul.f32 0.03125, %v70_v18 }
  0x82   :  { %v93_v22 = vmul.f32 0.03125, %v62_v21 }
  0x83   :  { %v114_v23 = vsub.f32 %v47_v1, %v95_v20  ;;  %v116_v45 = vsub.f32 %v707_v0, %v97_v37 }
  0x84   :  { %v112_v24 = vsub.f32 %v45_v2, %v93_v22 }
  0x85   :  { %v745_v25 = vsel %vm111_vm0, %v114_v23, 0.0  ;;  %v778_v54 = vsel %vm111_vm0, %v116_v45, 0.0 }
  0x86   :  { %v146_v26 = vmul.f32 %v745_v25, %v745_v25  ;;  %v751_v27 = vsel %vm111_vm0, %v112_v24, 0.0  ;;  %v148_v59 = vmul.f32 %v778_v54, %v778_v54 }
  0x87   :  { %v144_v28 = vmul.f32 %v751_v27, %v751_v27 }
  0x88   :  { %v72_v29 = vpop.xlane.xlu2 %71  ;;  %v68_v30 = vpop.xlane.xlu1 %67  ;;  %164 = vadd.xlane.f32.xlu0 %v146_v26 }
  0x89   :  { %v98_v31 = vmul.f32 0.03125, %v72_v29  ;;  %v96_v32 = vmul.f32 0.03125, %v68_v30  ;;  %160 = vadd.xlane.f32.xlu1 %v144_v28  ;;  %v64_v33 = vpop.xlane.xlu0 %63 }
  0x8a   :  { %v94_v34 = vmul.f32 0.03125, %v64_v33 }
  0x8b   :  { %v117_v35 = vsub.f32 %v50_v3, %v98_v31  ;;  %v115_v36 = vsub.f32 %v48_v4, %v96_v32 }
  0x8c   :  { %v113_v38 = vsub.f32 %v46_v5, %v94_v34 }
  0x8d   :  { %v757_v39 = vsel %vm111_vm0, %v117_v35, 0.0  ;;  %v761_v40 = vsel %vm111_vm0, %v115_v36, 0.0 }
  0x8e   :  { %v149_v41 = vmul.f32 %v757_v39, %v757_v39  ;;  %v147_v42 = vmul.f32 %v761_v40, %v761_v40  ;;  %v769_v43 = vsel %vm111_vm0, %v113_v38, 0.0 }
  0x8f   :  { %v145_v44 = vmul.f32 %v769_v43, %v769_v43 }
  0x90   :  { %v78_v46 = vpop.xlane.xlu2 %77  ;;  %170 = vadd.xlane.f32.xlu0 %v149_v41  ;;  %v76_v47 = vpop.xlane.xlu1 %75 }
  0x91   :  { %v101_v48 = vmul.f32 0.03125, %v78_v46  ;;  %166 = vadd.xlane.f32.xlu1 %v147_v42  ;;  %162 = vadd.xlane.f32.xlu2 %v145_v44  ;;  %v74_v49 = vpop.xlane.xlu0 %73  ;;  %v100_v51 = vmul.f32 0.03125, %v76_v47 }
  0x92   :  { %v99_v50 = vmul.f32 0.03125, %v74_v49 }
  0x93   :  { %v120_v52 = vsub.f32 %v710_v6, %v101_v48  ;;  %v119_v56 = vsub.f32 %v712_v7, %v100_v51 }
  0x94   :  { %v118_v53 = vsub.f32 %v714_v8, %v99_v50 }
  0x95   :  { %v782_v55 = vsel %vm111_vm0, %v120_v52, 0.0  ;;  %v797_v3 = vsel %vm111_vm0, %v119_v56, 0.0 }
  0x96   :  { %v152_v57 = vmul.f32 %v782_v55, %v782_v55  ;;  %v789_v58 = vsel %vm111_vm0, %v118_v53, 0.0  ;;  %v151_v7 = vmul.f32 %v797_v3, %v797_v3 }
  0x97   :  { %v150_v60 = vmul.f32 %v789_v58, %v789_v58 }
  0x98   :  { %v84_v61 = vpop.xlane.xlu2 %83  ;;  %176 = vadd.xlane.f32.xlu0 %v152_v57  ;;  %v82_v62 = vpop.xlane.xlu1 %81 }
  0x99   :  { %v104_v63 = vmul.f32 0.03125, %v84_v61  ;;  %168 = vadd.xlane.f32.xlu2 %v148_v59  ;;  %172 = vadd.xlane.f32.xlu1 %v150_v60  ;;  %v80_v0 = vpop.xlane.xlu0 %79  ;;  %v103_v2 = vmul.f32 0.03125, %v82_v62 }
  0x9a   :  { %v102_v1 = vmul.f32 0.03125, %v80_v0 }
  0x9b   :  { %v123_v4 = vsub.f32 %v719_v9, %v104_v63  ;;  %v122_v8 = vsub.f32 %v721_v10, %v103_v2 }
  0x9c   :  { %v121_v5 = vsub.f32 %v723_v11, %v102_v1 }
  0x9d   :  { %v803_v6 = vsel %vm111_vm0, %v123_v4, 0.0  ;;  %v818_v10 = vsel %vm111_vm0, %v122_v8, 0.0 }
  0x9e   :  { %v155_v16 = vmul.f32 %v803_v6, %v803_v6  ;;  %v812_v18 = vsel %vm111_vm0, %v121_v5, 0.0  ;;  %v154_v29 = vmul.f32 %v818_v10, %v818_v10 }
  0x9f   :  { %v153_v9 = vmul.f32 %v812_v18, %v812_v18 }
  0xa0   :  { %v90_v11 = vpop.xlane.xlu2 %89  ;;  %182 = vadd.xlane.f32.xlu0 %v155_v16  ;;  %v88_v19 = vpop.xlane.xlu1 %87 }
  0xa1   :  { %v107_v20 = vmul.f32 0.03125, %v90_v11  ;;  %174 = vadd.xlane.f32.xlu2 %v151_v7  ;;  %178 = vadd.xlane.f32.xlu1 %v153_v9  ;;  %v86_v21 = vpop.xlane.xlu0 %85  ;;  %v106_v23 = vmul.f32 0.03125, %v88_v19 }
  0xa2   :  { %v105_v22 = vmul.f32 0.03125, %v86_v21 }
  0xa3   :  { %v126_v24 = vsub.f32 %v728_v12, %v107_v20  ;;  %v125_v30 = vsub.f32 %v730_v13, %v106_v23 }
  0xa4   :  { %v124_v26 = vsub.f32 %v732_v14, %v105_v22 }
  0xa5   :  { %v824_v28 = vsel %vm111_vm0, %v126_v24, 0.0  ;;  %v839_v34 = vsel %vm111_vm0, %v125_v30, 0.0 }
  0xa6   :  { %v158_v31 = vmul.f32 %v824_v28, %v824_v28  ;;  %v833_v32 = vsel %vm111_vm0, %v124_v26, 0.0  ;;  %v157_v35 = vmul.f32 %v839_v34, %v839_v34 }
  0xa7   :  { %v156_v12 = vmul.f32 %v833_v32, %v833_v32 }
  0xa8   :  { %188 = vadd.xlane.f32.xlu0 %v158_v31 }
  0xa9   :  { %180 = vadd.xlane.f32.xlu2 %v154_v29  ;;  %184 = vadd.xlane.f32.xlu1 %v156_v12  ;;  %v92_v14 = vpop.xlane.xlu0 %91 }
  0xaa   :  { %v108_v33 = vmul.f32 0.03125, %v92_v14 }
  0xac   :  { %v127_v13 = vsub.f32 %v737_v15, %v108_v33 }
  0xae   :  { %v846_v36 = vsel %vm111_vm0, %v127_v13, 0.0 }
  0xaf   :  { %v159_v37 = vmul.f32 %v846_v36, %v846_v36 }
  0xb1   :  { %186 = vadd.xlane.f32.xlu2 %v157_v35  ;;  %190 = vadd.xlane.f32.xlu1 %v159_v37 }
  0xfb   :  { %v165_v38 = vpop.xlane.xlu0 %164 }
  0xfc   :  { %v161_v41 = vpop.xlane.xlu1 %160  ;;  %v194_v42 = vmul.f32 0.032258064, %v165_v38 }
  0xfd   :  { %v192_v44 = vmul.f32 0.032258064, %v161_v41 }
  0xfe   :  { %531 = vrsqrt.f32 %v194_v42  ;;  %vm239_vm1 = vcmp.eq.f32.partialorder %v194_v42, inf  ;;  %vm241_vm2 = vcmp.eq.f32.partialorder %v194_v42, 0.0  ;;  %v242_v0 = vand.u32 2147483648, %v194_v42 }
  0xff   :  { %533 = vrsqrt.f32 %v192_v44  ;;  %vm215_vm3 = vcmp.eq.f32.partialorder %v192_v44, inf  ;;  %vm217_vm4 = vcmp.eq.f32.partialorder %v192_v44, 0.0  ;;  %v218_v26 = vand.u32 2147483648, %v192_v44 }
 0x103   :  { %v171_v45 = vpop.xlane.xlu0 %170 }
 0x104   :  { %v532_v15 = vpop.eup %531  ;;  %v167_v46 = vpop.xlane.xlu1 %166  ;;  %v850_v48 = vmul.f32 0.032258064, %v171_v45 }
 0x105   :  { %v163_v47 = vpop.xlane.xlu2 %162  ;;  %v534_v17 = vpop.eup %533  ;;  %v233_v49 = vmul.f32 %v532_v15, %v194_v42  ;;  %v852_v50 = vmul.f32 0.032258064, %v167_v46 }
 0x106   :  { %v854_v51 = vmul.f32 0.032258064, %v163_v47  ;;  %v209_v52 = vmul.f32 %v534_v17, %v192_v44  ;;  %535 = vrsqrt.f32 %v850_v48  ;;  %vm275_vm5 = vcmp.eq.f32.partialorder %v850_v48, inf }
 0x107   :  { %v234_v53 = vmul.f32 %v532_v15, %v233_v49  ;;  %537 = vrsqrt.f32 %v852_v50  ;;  %vm251_vm6 = vcmp.eq.f32.partialorder %v852_v50, inf  ;;  %vm277_vm7 = vcmp.eq.f32.partialorder %v850_v48, 0.0 }
 0x108   :  { %v210_v56 = vmul.f32 %v534_v17, %v209_v52  ;;  %539 = vrsqrt.f32 %v854_v51  ;;  %vm253_vm8 = vcmp.eq.f32.partialorder %v852_v50, 0.0  ;;  %v254_v47 = vand.u32 2147483648, %v852_v50 }
 0x109   :  { %v235_v57 = vmul.f32 0.5, %v234_v53  ;;  %vm227_vm9 = vcmp.eq.f32.partialorder %v854_v51, inf  ;;  %vm229_vm10 = vcmp.eq.f32.partialorder %v854_v51, 0.0 }
 0x10a   :  { %v211_v59 = vmul.f32 0.5, %v210_v56 }
 0x10b   :  { %v236_v60 = vsub.f32 1.5, %v235_v57  ;;  %v177_v61 = vpop.xlane.xlu0 %176 }
 0x10c   :  { %v536_v62 = vpop.eup %535  ;;  %v212_v63 = vsub.f32 1.5, %v211_v59  ;;  %v173_v2 = vpop.xlane.xlu1 %172  ;;  %v859_v4 = vmul.f32 0.032258064, %v177_v61 }
 0x10d   :  { %v169_v1 = vpop.xlane.xlu2 %168  ;;  %v538_v5 = vpop.eup %537  ;;  %v237_v7 = vmul.f32 %v532_v15, %v236_v60  ;;  %v269_v8 = vmul.f32 %v536_v62, %v850_v48  ;;  %v865_v20 = vmul.f32 0.032258064, %v173_v2  ;;  %v230_v60 = vand.u32 2147483648, %v854_v51 }
 0x10e   :  { %v862_v16 = vmul.f32 0.032258064, %v169_v1  ;;  %v540_v9 = vpop.eup %539  ;;  %v213_v11 = vmul.f32 %v534_v17, %v212_v63  ;;  %v245_v19 = vmul.f32 %v538_v5, %v852_v50  ;;  %541 = vrsqrt.f32 %v859_v4 }
 0x10f   :  { %v238_v21 = vmul.f32 %v237_v7, %v194_v42  ;;  %v221_v22 = vmul.f32 %v540_v9, %v854_v51  ;;  %v270_v23 = vmul.f32 %v536_v62, %v269_v8  ;;  %v278_v63 = vand.u32 2147483648, %v850_v48 }
 0x110   :  { %543 = vrsqrt.f32 %v862_v16  ;;  %v214_v24 = vmul.f32 %v213_v11, %v192_v44  ;;  %v246_v29 = vmul.f32 %v538_v5, %v245_v19  ;;  %vm263_vm11 = vcmp.eq.f32.partialorder %v862_v16, inf  ;;  %v898_v19 = vld [vmem:[#allocation5] ss:$0 sm:$0xff] }
 0x111   :  { %v240_v30 = vsel %vm239_vm1, %v194_v42, %v238_v21  ;;  %v222_v31 = vmul.f32 %v540_v9, %v221_v22  ;;  %v271_v12 = vmul.f32 0.5, %v270_v23  ;;  %545 = vrsqrt.f32 %v865_v20 }
 0x112   :  { %v216_v14 = vsel %vm215_vm3, %v192_v44, %v214_v24  ;;  %v243_v33 = vsel %vm241_vm2, %v242_v0, %v240_v30  ;;  %v247_v13 = vmul.f32 0.5, %v246_v29  ;;  %vm265_vm12 = vcmp.eq.f32.partialorder %v862_v16, 0.0 }
 0x113   :  { %v219_v35 = vsel %vm217_vm4, %v218_v26, %v216_v14  ;;  %v402_v37 = vadd.f32 1e-06, %v243_v33  ;;  %v223_v38 = vmul.f32 0.5, %v222_v31  ;;  %v272_v41 = vsub.f32 1.5, %v271_v12 }
 0x114   :  { %v542_v45 = vpop.eup %541  ;;  %v400_v15 = vadd.f32 1e-06, %v219_v35  ;;  %v248_v46 = vsub.f32 1.5, %v247_v13  ;;  %v179_v57 = vpop.xlane.xlu1 %178  ;;  %vm311_vm13 = vcmp.eq.f32.partialorder %v859_v4, inf  ;;  %vm287_vm14 = vcmp.eq.f32.partialorder %v865_v20, inf }
 0x115   :  { %547 = vrcp.f32 %v402_v37  ;;  %v224_v42 = vsub.f32 1.5, %v223_v38  ;;  %v273_v49 = vmul.f32 %v536_v62, %v272_v41  ;;  %v175_v52 = vpop.xlane.xlu2 %174  ;;  %v305_v56 = vmul.f32 %v542_v45, %v859_v4 }
 0x116   :  { %v544_v17 = vpop.eup %543  ;;  %549 = vrcp.f32 %v400_v15  ;;  %v249_v44 = vmul.f32 %v538_v5, %v248_v46  ;;  %v888_v7 = vmul.f32 0.032258064, %v175_v52  ;;  %v896_v11 = vmul.f32 0.032258064, %v179_v57 }
 0x117   :  { %v257_v53 = vmul.f32 %v544_v17, %v862_v16  ;;  %v225_v59 = vmul.f32 %v540_v9, %v224_v42  ;;  %v274_v61 = vmul.f32 %v273_v49, %v850_v48  ;;  %v546_v0 = vpop.eup %545  ;;  %v306_v62 = vmul.f32 %v542_v45, %v305_v56 }
 0x118   :  { %v250_v1 = vmul.f32 %v249_v44, %v852_v50  ;;  %v281_v9 = vmul.f32 %v546_v0, %v865_v20  ;;  %vm289_vm15 = vcmp.eq.f32.partialorder %v865_v20, 0.0  ;;  %v290_v57 = vand.u32 2147483648, %v865_v20 }
 0x119   :  { %v258_v2 = vmul.f32 %v544_v17, %v257_v53  ;;  %v226_v5 = vmul.f32 %v225_v59, %v854_v51  ;;  %v276_v8 = vsel %vm275_vm5, %v850_v48, %v274_v61  ;;  %v307_v24 = vmul.f32 0.5, %v306_v62  ;;  %v915_v48 = vld [vmem:[%s1089_s2] ss:$0 sm:$0xff]  ;;  %s677_s2 = smov [#allocation7]  }
 0x11a   :  { %v252_v21 = vsel %vm251_vm6, %v852_v50, %v250_v1  ;;  %v279_v22 = vsel %vm277_vm7, %v278_v63, %v276_v8  ;;  %v282_v12 = vmul.f32 %v546_v0, %v281_v9  ;;  %vm313_vm0 = vcmp.eq.f32.partialorder %v859_v4, 0.0  ;;  %s508_s24 = sshll.u32 %s677_s2, 4  ;;  %s509_s24 = int_to_ptr.vmem [resolvable:$true] %s508_s24 }
 0x11b   :  { %v259_v23 = vmul.f32 0.5, %v258_v2  ;;  %v548_v26 = vpop.eup %547  ;;  %v255_v29 = vsel %vm253_vm8, %v254_v47, %v252_v21  ;;  %v228_v30 = vsel %vm227_vm9, %v854_v51, %v226_v5  ;;  %v405_v31 = vadd.f32 1e-06, %v279_v22 }
 0x11c   :  { %v550_v14 = vpop.eup %549  ;;  %v435_v33 = vmul.f32 %v548_v26, %v745_v25  ;;  %v403_v13 = vadd.f32 1e-06, %v255_v29  ;;  %v231_v50 = vsel %vm229_vm10, %v230_v60, %v228_v30  ;;  %v283_v41 = vmul.f32 0.5, %v282_v12 }
 0x11d   :  { %v260_v35 = vsub.f32 1.5, %v259_v23  ;;  %v433_v37 = vmul.f32 %v550_v14, %v751_v27  ;;  %v401_v38 = vadd.f32 1e-06, %v231_v50  ;;  %551 = vrcp.f32 %v405_v31  ;;  %v183_v27 = vpop.xlane.xlu0 %182  ;;  %v185_v50 = vpop.xlane.xlu1 %184 }
 0x11e   :  { %v454_v15 = vmul.f32 %v898_v19, %v435_v33  ;;  %553 = vrcp.f32 %v403_v13  ;;  %v308_v47 = vsub.f32 1.5, %v307_v24  ;;  %v266_v25 = vand.u32 2147483648, %v862_v16 }
 0x11f   :  { %v261_v46 = vmul.f32 %v544_v17, %v260_v35  ;;  %v452_v42 = vmul.f32 %v898_v19, %v433_v37  ;;  %555 = vrcp.f32 %v401_v38  ;;  %v284_v49 = vsub.f32 1.5, %v283_v41 }
 0x120   :  { %v474_v51 = vadd.f32 %v915_v48, %v454_v15  ;;  %v309_v44 = vmul.f32 %v542_v45, %v308_v47  ;;  %557 = vrsqrt.f32 %v888_v7  ;;  %v181_v45 = vpop.xlane.xlu2 %180  ;;  %v945_v8 = vmul.f32 0.032258064, %v183_v27 }
 0x121   :  { %v262_v52 = vmul.f32 %v261_v46, %v862_v16  ;;  %v472_v53 = vadd.f32 %v915_v48, %v452_v42  ;;  %v285_v56 = vmul.f32 %v546_v0, %v284_v49  ;;  %559 = vrsqrt.f32 %v896_v11 }
 0x122   :  { %490 = vst [vmem:[#allocation7 + $0x10] sm:$0xff] %v474_v51  ;;  %v310_v59 = vmul.f32 %v309_v44, %v859_v4  ;;  %v314_v0 = vand.u32 2147483648, %v859_v4  ;;  %v951_v23 = vmul.f32 0.032258064, %v181_v45  ;;  %vm299_vm1 = vcmp.eq.f32.partialorder %v888_v7, inf }
 0x123   :  { %v264_v17 = vsel %vm263_vm11, %v862_v16, %v262_v52  ;;  %v552_v60 = vpop.eup %551  ;;  %488 = vst [vmem:[#allocation7] sm:$0xff] %v472_v53  ;;  %v286_v63 = vmul.f32 %v285_v56, %v865_v20  ;;  %v967_v46 = vmul.f32 0.032258064, %v185_v50  ;;  %vm301_vm2 = vcmp.eq.f32.partialorder %v888_v7, 0.0 }
 0x124   :  { %v267_v61 = vsel %vm265_vm12, %v266_v25, %v264_v17  ;;  %v554_v1 = vpop.eup %553  ;;  %v438_v2 = vmul.f32 %v552_v60, %v757_v39  ;;  %v312_v5 = vsel %vm311_vm13, %v859_v4, %v310_v59  ;;  %v302_v52 = vand.u32 2147483648, %v888_v7 }
 0x125   :  { %v404_v62 = vadd.f32 1e-06, %v267_v61  ;;  %v556_v9 = vpop.eup %555  ;;  %v436_v16 = vmul.f32 %v554_v1, %v761_v40  ;;  %v288_v21 = vsel %vm287_vm14, %v865_v20, %v286_v63  ;;  %v315_v22 = vsel %vm313_vm0, %v314_v0, %v312_v5  ;;  %v189_v37 = vpop.xlane.xlu0 %188 }
 0x126   :  { %v558_v24 = vpop.eup %557  ;;  %v434_v39 = vmul.f32 %v556_v9, %v769_v43  ;;  %v457_v26 = vmul.f32 %v898_v19, %v438_v2  ;;  %v291_v4 = vsel %vm289_vm15, %v290_v57, %v288_v21  ;;  %v408_v40 = vadd.f32 1e-06, %v315_v22  ;;  %v191_v50 = vpop.xlane.xlu1 %190 }
 0x127   :  { %561 = vrcp.f32 %v404_v62  ;;  %v455_v29 = vmul.f32 %v898_v19, %v436_v16  ;;  %v406_v30 = vadd.f32 1e-06, %v291_v4  ;;  %v293_v31 = vmul.f32 %v558_v24, %v888_v7  ;;  %v560_v12 = vpop.eup %559 }
 0x128   :  { %v453_v14 = vmul.f32 %v898_v19, %v434_v39  ;;  %v477_v33 = vadd.f32 %v915_v48, %v457_v26  ;;  %563 = vrsqrt.f32 %v945_v8  ;;  %v317_v20 = vmul.f32 %v560_v12, %v896_v11  ;;  %v187_v45 = vpop.xlane.xlu2 %186 }
 0x129   :  { %v475_v43 = vadd.f32 %v915_v48, %v455_v29  ;;  %565 = vrcp.f32 %v406_v30  ;;  %v294_v13 = vmul.f32 %v558_v24, %v293_v31  ;;  %v970_v49 = vmul.f32 0.032258064, %v189_v37 }
 0x12a   :  { %v473_v35 = vadd.f32 %v915_v48, %v453_v14  ;;  %493 = vst [vmem:[#allocation7 + $0x28] sm:$0xff] %v477_v33  ;;  %567 = vrcp.f32 %v408_v40  ;;  %v318_v41 = vmul.f32 %v560_v12, %v317_v20  ;;  %vm323_vm3 = vcmp.eq.f32.partialorder %v896_v11, inf }
 0x12b   :  { %491 = vst [vmem:[#allocation7 + $0x18] sm:$0xff] %v475_v43  ;;  %v295_v38 = vmul.f32 0.5, %v294_v13  ;;  %569 = vrsqrt.f32 %v951_v23  ;;  %vm325_vm4 = vcmp.eq.f32.partialorder %v896_v11, 0.0  ;;  %v326_v59 = vand.u32 2147483648, %v896_v11 }
 0x12c   :  { %489 = vst [vmem:[#allocation7 + $0x8] sm:$0xff] %v473_v35  ;;  %v319_v25 = vmul.f32 0.5, %v318_v41  ;;  %571 = vrsqrt.f32 %v967_v46  ;;  %vm347_vm5 = vcmp.eq.f32.partialorder %v945_v8, inf  ;;  %vm349_vm6 = vcmp.eq.f32.partialorder %v945_v8, 0.0 }
 0x12d   :  { %v562_v15 = vpop.eup %561  ;;  %v296_v42 = vsub.f32 1.5, %v295_v38  ;;  %573 = vrsqrt.f32 %v970_v49  ;;  %vm335_vm7 = vcmp.eq.f32.partialorder %v951_v23, inf  ;;  %vm337_vm8 = vcmp.eq.f32.partialorder %v951_v23, 0.0 }
 0x12e   :  { %v437_v47 = vmul.f32 %v562_v15, %v778_v54  ;;  %v564_v51 = vpop.eup %563  ;;  %v320_v56 = vsub.f32 1.5, %v319_v25  ;;  %vm359_vm9 = vcmp.eq.f32.partialorder %v967_v46, inf  ;;  %vm361_vm10 = vcmp.eq.f32.partialorder %v967_v46, 0.0 }
 0x12f   :  { %v566_v44 = vpop.eup %565  ;;  %v297_v53 = vmul.f32 %v558_v24, %v296_v42  ;;  %v341_v54 = vmul.f32 %v564_v51, %v945_v8  ;;  %v1014_v42 = vmul.f32 0.032258064, %v191_v50  ;;  %vm383_vm11 = vcmp.eq.f32.partialorder %v970_v49, inf }
 0x130   :  { %v456_v27 = vmul.f32 %v898_v19, %v437_v47  ;;  %v568_v17 = vpop.eup %567  ;;  %v439_v57 = vmul.f32 %v566_v44, %v789_v58  ;;  %v321_v1 = vmul.f32 %v560_v12, %v320_v56  ;;  %v350_v58 = vand.u32 2147483648, %v945_v8 }
 0x131   :  { %v570_v60 = vpop.eup %569  ;;  %v441_v63 = vmul.f32 %v568_v17, %v782_v55  ;;  %v298_v0 = vmul.f32 %v297_v53, %v888_v7  ;;  %v342_v62 = vmul.f32 %v564_v51, %v341_v54  ;;  %v994_v55 = vmul.f32 0.032258064, %v187_v45 }
 0x132   :  { %v476_v61 = vadd.f32 %v915_v48, %v456_v27  ;;  %v458_v2 = vmul.f32 %v898_v19, %v439_v57  ;;  %v329_v5 = vmul.f32 %v570_v60, %v951_v23  ;;  %v322_v21 = vmul.f32 %v321_v1, %v896_v11  ;;  %v572_v22 = vpop.eup %571 }
 0x133   :  { %v460_v9 = vmul.f32 %v898_v19, %v441_v63  ;;  %v300_v16 = vsel %vm299_vm1, %v888_v7, %v298_v0  ;;  %v343_v26 = vmul.f32 0.5, %v342_v62  ;;  %v353_v31 = vmul.f32 %v572_v22, %v967_v46  ;;  %v574_v12 = vpop.eup %573 }
 0x134   :  { %492 = vst [vmem:[#allocation7 + $0x20] sm:$0xff] %v476_v61  ;;  %v478_v24 = vadd.f32 %v915_v48, %v458_v2  ;;  %v303_v39 = vsel %vm301_vm2, %v302_v52, %v300_v16  ;;  %v330_v4 = vmul.f32 %v570_v60, %v329_v5  ;;  %v324_v40 = vsel %vm323_vm3, %v896_v11, %v322_v21 }
 0x135   :  { %v480_v29 = vadd.f32 %v915_v48, %v460_v9  ;;  %v407_v30 = vadd.f32 1e-06, %v303_v39  ;;  %v327_v14 = vsel %vm325_vm4, %v326_v59, %v324_v40  ;;  %v344_v7 = vsub.f32 1.5, %v343_v26 }
 0x136   :  { %494 = vst [vmem:[#allocation7 + $0x30] sm:$0xff] %v478_v24  ;;  %v331_v33 = vmul.f32 0.5, %v330_v4  ;;  %575 = vrsqrt.f32 %v994_v55  ;;  %v409_v43 = vadd.f32 1e-06, %v327_v14  ;;  %v354_v13 = vmul.f32 %v572_v22, %v353_v31 }
 0x137   :  { %496 = vst [vmem:[#allocation7 + $0x40] sm:$0xff] %v480_v29  ;;  %577 = vrcp.f32 %v407_v30  ;;  %v377_v20 = vmul.f32 %v574_v12, %v970_v49  ;;  %v345_v35 = vmul.f32 %v564_v51, %v344_v7  ;;  %v338_v11 = vand.u32 2147483648, %v951_v23 }
 0x138   :  { %v332_v37 = vsub.f32 1.5, %v331_v33  ;;  %579 = vrcp.f32 %v409_v43  ;;  %v355_v38 = vmul.f32 0.5, %v354_v13  ;;  %v362_v51 = vand.u32 2147483648, %v967_v46 }
 0x139   :  { %v378_v41 = vmul.f32 %v574_v12, %v377_v20  ;;  %v346_v15 = vmul.f32 %v345_v35, %v945_v8  ;;  %581 = vrsqrt.f32 %v1014_v42  ;;  %vm385_vm12 = vcmp.eq.f32.partialorder %v970_v49, 0.0 }
 0x13a   :  { %v333_v47 = vmul.f32 %v570_v60, %v332_v37  ;;  %v356_v25 = vsub.f32 1.5, %v355_v38  ;;  %v386_v16 = vand.u32 2147483648, %v970_v49  ;;  %vm371_vm13 = vcmp.eq.f32.partialorder %v994_v55, inf }
 0x13b   :  { %v379_v52 = vmul.f32 0.5, %v378_v41  ;;  %v348_v27 = vsel %vm347_vm5, %v945_v8, %v346_v15  ;;  %vm373_vm14 = vcmp.eq.f32.partialorder %v994_v55, 0.0  ;;  %vm395_vm15 = vcmp.eq.f32.partialorder %v1014_v42, inf }
 0x13c   :  { %v576_v44 = vpop.eup %575  ;;  %v334_v53 = vmul.f32 %v333_v47, %v951_v23  ;;  %v351_v54 = vsel %vm349_vm6, %v350_v58, %v348_v27  ;;  %v357_v17 = vmul.f32 %v572_v22, %v356_v25  ;;  %v398_v27 = vand.u32 2147483648, %v1014_v42 }
 0x13d   :  { %v578_v56 = vpop.eup %577  ;;  %v380_v57 = vsub.f32 1.5, %v379_v52  ;;  %v365_v59 = vmul.f32 %v576_v44, %v994_v55  ;;  %v411_v60 = vadd.f32 1e-06, %v351_v54  ;;  %vm397_vm0 = vcmp.eq.f32.partialorder %v1014_v42, 0.0 }
 0x13e   :  { %v440_v45 = vmul.f32 %v578_v56, %v797_v3  ;;  %v336_v61 = vsel %vm335_vm7, %v951_v23, %v334_v53  ;;  %v580_v63 = vpop.eup %579  ;;  %v358_v8 = vmul.f32 %v357_v17, %v967_v46 }
 0x13f   :  { %v339_v0 = vsel %vm337_vm8, %v338_v11, %v336_v61  ;;  %v381_v1 = vmul.f32 %v574_v12, %v380_v57  ;;  %v366_v2 = vmul.f32 %v576_v44, %v365_v59  ;;  %v442_v58 = vmul.f32 %v580_v63, %v812_v18  ;;  %v582_v21 = vpop.eup %581 }
 0x140   :  { %v459_v62 = vmul.f32 %v898_v19, %v440_v45  ;;  %583 = vrcp.f32 %v411_v60  ;;  %v410_v3 = vadd.f32 1e-06, %v339_v0  ;;  %v360_v5 = vsel %vm359_vm9, %v967_v46, %v358_v8 }
 0x141   :  { %v382_v9 = vmul.f32 %v381_v1, %v970_v49  ;;  %v367_v23 = vmul.f32 0.5, %v366_v2  ;;  %v461_v24 = vmul.f32 %v898_v19, %v442_v58  ;;  %v363_v18 = vsel %vm361_vm10, %v362_v51, %v360_v5 }
 0x142   :  { %v479_v22 = vadd.f32 %v915_v48, %v459_v62  ;;  %585 = vrcp.f32 %v410_v3  ;;  %v412_v39 = vadd.f32 1e-06, %v363_v18  ;;  %v389_v29 = vmul.f32 %v582_v21, %v1014_v42 }
 0x143   :  { %v384_v26 = vsel %vm383_vm11, %v970_v49, %v382_v9  ;;  %v368_v4 = vsub.f32 1.5, %v367_v23  ;;  %v481_v30 = vadd.f32 %v915_v48, %v461_v24  ;;  %v374_v49 = vand.u32 2147483648, %v994_v55 }
 0x144   :  { %495 = vst [vmem:[#allocation7 + $0x38] sm:$0xff] %v479_v22  ;;  %v387_v40 = vsel %vm385_vm12, %v386_v16, %v384_v26  ;;  %587 = vrcp.f32 %v412_v39  ;;  %v390_v14 = vmul.f32 %v582_v21, %v389_v29 }
 0x145   :  { %v414_v31 = vadd.f32 1e-06, %v387_v40  ;;  %v369_v12 = vmul.f32 %v576_v44, %v368_v4  ;;  %497 = vst [vmem:[#allocation7 + $0x48] sm:$0xff] %v481_v30 }
 0x146   :  { %v584_v46 = vpop.eup %583  ;;  %v391_v43 = vmul.f32 0.5, %v390_v14 }
 0x147   :  { %v444_v7 = vmul.f32 %v584_v46, %v803_v6  ;;  %589 = vrcp.f32 %v414_v31  ;;  %v370_v33 = vmul.f32 %v369_v12, %v994_v55 }
 0x148   :  { %v586_v13 = vpop.eup %585  ;;  %v392_v37 = vsub.f32 1.5, %v391_v43 }
 0x149   :  { %v463_v20 = vmul.f32 %v898_v19, %v444_v7  ;;  %v443_v50 = vmul.f32 %v586_v13, %v818_v10  ;;  %v372_v35 = vsel %vm371_vm13, %v994_v55, %v370_v33 }
 0x14a   :  { %v375_v11 = vsel %vm373_vm14, %v374_v49, %v372_v35  ;;  %v588_v6 = vpop.eup %587  ;;  %v393_v47 = vmul.f32 %v582_v21, %v392_v37 }
 0x14b   :  { %v483_v38 = vadd.f32 %v915_v48, %v463_v20  ;;  %v462_v41 = vmul.f32 %v898_v19, %v443_v50  ;;  %v413_v15 = vadd.f32 1e-06, %v375_v11  ;;  %v445_v25 = vmul.f32 %v588_v6, %v833_v32 }
 0x14c   :  { %v394_v10 = vmul.f32 %v393_v47, %v1014_v42 }
 0x14d   :  { %v590_v51 = vpop.eup %589  ;;  %499 = vst [vmem:[#allocation7 + $0x58] sm:$0xff] %v483_v38  ;;  %v482_v52 = vadd.f32 %v915_v48, %v462_v41  ;;  %591 = vrcp.f32 %v413_v15  ;;  %v464_v55 = vmul.f32 %v898_v19, %v445_v25 }
 0x14e   :  { %v447_v44 = vmul.f32 %v590_v51, %v824_v28  ;;  %v396_v53 = vsel %vm395_vm15, %v1014_v42, %v394_v10 }
 0x14f   :  { %498 = vst [vmem:[#allocation7 + $0x50] sm:$0xff] %v482_v52  ;;  %v484_v32 = vadd.f32 %v915_v48, %v464_v55  ;;  %v399_v54 = vsel %vm397_vm0, %v398_v27, %v396_v53 }
 0x150   :  { %v466_v56 = vmul.f32 %v898_v19, %v447_v44  ;;  %v415_v17 = vadd.f32 1e-06, %v399_v54 }
 0x151   :  { %500 = vst [vmem:[#allocation7 + $0x60] sm:$0xff] %v484_v32 }
 0x152   :  { %v486_v57 = vadd.f32 %v915_v48, %v466_v56  ;;  %593 = vrcp.f32 %v415_v17 }
 0x153   :  { %v592_v59 = vpop.eup %591 }
 0x154   :  { %502 = vst [vmem:[#allocation7 + $0x70] sm:$0xff] %v486_v57  ;;  %v446_v28 = vmul.f32 %v592_v59, %v839_v34 }
 0x156   :  { %v465_v45 = vmul.f32 %v898_v19, %v446_v28 }
 0x158   :  { %v485_v60 = vadd.f32 %v915_v48, %v465_v45  ;;  %v594_v61 = vpop.eup %593 }
 0x159   :  { %v448_v42 = vmul.f32 %v594_v61, %v846_v36 }
 0x15a   :  { %501 = vst [vmem:[#allocation7 + $0x68] sm:$0xff] %v485_v60 }
 0x15b   :  { %v467_v63 = vmul.f32 %v898_v19, %v448_v42 }
 0x15d   :  { %v487_v0 = vadd.f32 %v915_v48, %v467_v63 }
 0x15f   :  { %503 = vst [vmem:[#allocation7 + $0x78] sm:$0xff] %v487_v0 }
 0x160   :  { %516 = dma.vmem_to_hbm [thread:$0]  %s509_s24, 2048, %s511_s27, [#allocation4], %s674_s20, %s674_s20, %s675_s21  }
 0x161   :  { %671 = dma.done.wait [#allocation4], 2048  }
 0x162   :  { %672 = vsyncadd [#allocation4], 4294965248 }
 0x163   :  { %521 = vsyncpa [#allocation3], 1 }
 0x164   :  { %522 = vsyncpa [#allocation6], 1 }
 0x165   :  { %523 = vsyncpa [#allocation4], 1 }

</bundles_post_ra>
